<compile_context>
chip_gen: v7x
topology: tpu7x:2x2x1
jax: 0.10.0
libtpu: 0.0.40
codegen_flags: <defaults>
</compile_context>

<pallas_src>
from functools import partial

import numpy as np
import jax
import jax.numpy as jnp
from jax import lax
from jax.experimental import pallas as pl
from jax.experimental.pallas import tpu as pltpu


# --------------------------------------------------------------------------- #
# Generation-aware VMEM budgets.
# --------------------------------------------------------------------------- #
def _tpu_vmem_bytes():
    """Per-core VMEM capacity; conservative (v7x) fallback if the query fails."""
    try:
        info = pltpu.get_tpu_info()
        for name in ("vmem_capacity_bytes", "vmem_size_bytes", "vmem_bytes"):
            val = getattr(info, name, None)
            if val:
                return int(val)
    except Exception:
        pass
    return 64 * 1024 * 1024  # v7x per-core VMEM — safe lower bound


def _budgets():
    cap = _tpu_vmem_bytes()
    # v7x (64 MiB):  ~4 MiB x-blocks, 40 MiB compiler limit.
    # v5e/v6e (128): ~8 MiB x-blocks, 80 MiB compiler limit.
    block_budget = cap // 16
    vmem_limit = int(min(cap * 5 // 8, 96 * 1024 * 1024))
    return block_budget, vmem_limit


def _pick_t_tile(T, Vp, C, itemsize, budget_bytes):
    """T-tile for the two-stage fallback.

    Preference order:
      1. full T if the per-sample slab fits the budget,
      2. largest divisor of T within budget with lane-dense width (t*Vp % 128 == 0),
      3. smallest lane-dense divisor (over budget but still compiles),
      4. full T (block == full extent is always legal).
    No ValueError path: awkward (T, V) degrade gracefully instead of failing.
    """
    if C * T * Vp * itemsize <= budget_bytes:
        return T
    divisors = [t for t in range(1, T + 1) if T % t == 0]
    dense = [t for t in divisors if (t * Vp) % 128 == 0]
    in_budget = [t for t in dense if C * t * Vp * itemsize <= budget_bytes]
    if in_budget:
        return max(in_budget)
    if dense:
        return min(dense)
    return T


# --------------------------------------------------------------------------- #
# Shared gate math: pooled (C, Vp) -> scale (C, Vp) = 1 + sigmoid(convs(pooled)).
# --------------------------------------------------------------------------- #
def _joint_conv_gate(pooled, w_cat, b_sp, w_ex, b_ex, *, k_taps, pad):
    """K-tap 'same' joint conv fused into ONE MXU matmul over an im2col stack,
    then the 1x1 expand conv, bias, sigmoid, and the folded '+ x' residual.

    Shifts use static lane slices + concat with zeros; with the joint axis
    zero-padded to Vp on the host this is exact for every tap.  pltpu.roll is
    deliberately not used: the joint dim is < 128 lanes (not a native lane
    rotate) and this runs once per sample, off the HBM-bound critical path.
    """
    C, Vp = pooled.shape
    parts = []
    for k in range(k_taps):
        off = k - pad
        if off == 0:
            parts.append(pooled)
        elif off > 0:
            parts.append(jnp.concatenate(
                [pooled[:, off:], jnp.zeros((C, off), jnp.float32)], axis=1))
        else:
            parts.append(jnp.concatenate(
                [jnp.zeros((C, -off), jnp.float32), pooled[:, :Vp + off]], axis=1))
    pooled_cat = jnp.concatenate(parts, axis=0)                      # (K*C, Vp)

    y = jnp.dot(w_cat, pooled_cat, preferred_element_type=jnp.float32)
    y = jnp.maximum(y + b_sp, 0.0)                                   # (Cr, Vp)
    z = jnp.dot(w_ex, y, preferred_element_type=jnp.float32) + b_ex  # (C, Vp)
    return 1.0 + jax.nn.sigmoid(z)                                   # f32


# --------------------------------------------------------------------------- #
# Fused single-pass kernel.  Grid = (N,).  x read once, out written once.
# --------------------------------------------------------------------------- #
def _sce_fused_kernel(x_ref, pool_ref, w_cat_ref, b_sp_ref, w_ex_ref, b_ex_ref,
                      bcast_ref, o_ref, *, t_total, k_taps, pad):
    xb = x_ref[0]                                       # (C, T*Vp), lane-dense, x.dtype
    pool = pool_ref[...]                                # (T*Vp, Vp), x.dtype 0/1 matrix
    # Temporal mean pool on the otherwise-idle MXU (f32 accumulation).
    pooled = jnp.dot(xb, pool, preferred_element_type=jnp.float32) * (1.0 / t_total)
    scale = _joint_conv_gate(pooled, w_cat_ref[...], b_sp_ref[...],
                             w_ex_ref[...], b_ex_ref[...],
                             k_taps=k_taps, pad=pad)    # (C, Vp) f32
    # Broadcast the gate back over T with a 0/1 matrix (MXU); keeps the
    # elementwise multiply and the store fully lane-dense (no relayout reshape).
    bc = bcast_ref[...]                                 # (Vp, T*Vp), x.dtype
    s = jnp.dot(scale.astype(bc.dtype), bc, preferred_element_type=jnp.float32)
    o_ref[0] = (xb * s).astype(o_ref.dtype)


# --------------------------------------------------------------------------- #
# Two-stage fallback (per-sample slab does not fit the block budget).
# Stage A: tiled temporal pooling + gate.   Grid = (N, T_blocks).
# --------------------------------------------------------------------------- #
def _sce_gate_kernel(x_ref, pool_ref, w_cat_ref, b_sp_ref, w_ex_ref, b_ex_ref,
                     scale_ref, acc_ref, *, n_t_blocks, t_total, k_taps, pad):
    # NOTE: this accumulate-then-finalize scheme is only correct because the
    # T-block axis is the LAST (innermost, sequentially executed) grid axis and
    # is marked "arbitrary" in dimension_semantics.  Do not reorder the grid or
    # mark it "parallel".
    tb = pl.program_id(1)

    @pl.when(tb == 0)
    def _init():
        acc_ref[...] = jnp.zeros_like(acc_ref)

    # Partial temporal sum for this T-tile: lane-dense x load, 0/1-matrix matmul.
    acc_ref[...] += jnp.dot(x_ref[0], pool_ref[...],
                            preferred_element_type=jnp.float32)

    @pl.when(tb == n_t_blocks - 1)
    def _finalize():
        pooled = acc_ref[...] * (1.0 / t_total)         # mean over T
        scale_ref[0] = _joint_conv_gate(pooled, w_cat_ref[...], b_sp_ref[...],
                                        w_ex_ref[...], b_ex_ref[...],
                                        k_taps=k_taps, pad=pad)


# Stage B: streaming residual multiply, fully lane-dense.  Grid = (N, T_blocks).
def _sce_apply_kernel(x_ref, scale_ref, bcast_ref, o_ref):
    bc = bcast_ref[...]
    s = jnp.dot(scale_ref[0].astype(bc.dtype), bc, preferred_element_type=jnp.float32)
    o_ref[0] = (x_ref[0] * s).astype(o_ref.dtype)


# --------------------------------------------------------------------------- #
# Wrapper.
# --------------------------------------------------------------------------- #
def sce_forward(x, w_sp, b_sp, w_ex, b_ex, *, t_tile=None, force_two_stage=False):
    """x: (N, C, T, V).  w_sp: (Cr, C, K), b_sp: (Cr,), w_ex: (C, Cr, 1), b_ex: (C,)."""
    N, C, T, V = x.shape
    Cr, _, K = w_sp.shape
    pad = (K - 1) // 2
    dt = x.dtype
    itemsize = dt.itemsize

    block_budget, vmem_limit = _budgets()

    # Pad the joint axis to a multiple of 8 so lane-dense tilings are reachable
    # for any skeleton (e.g. V=25 -> 32); padded columns are zero, which keeps
    # pooling, the 'same' joint conv and the residual multiply exact.
    Vp = -(-V // 8) * 8
    x_p = x if Vp == V else jnp.pad(x, ((0, 0), (0, 0), (0, 0), (0, Vp - V)))
    x_flat = x_p.reshape(N, C, T * Vp)

    # Host-side parameter prep (gate math stays f32).
    w_cat = jnp.transpose(w_sp, (0, 2, 1)).reshape(Cr, K * C).astype(jnp.float32)
    b_sp2 = b_sp.reshape(Cr, 1).astype(jnp.float32)
    w_ex2 = w_ex[..., 0].astype(jnp.float32)                        # (C, Cr)
    b_ex2 = b_ex.reshape(C, 1).astype(jnp.float32)

    fused_ok = (not force_two_stage) and (t_tile is None or t_tile == T) \
        and (C * T * Vp * itemsize <= block_budget)

    if fused_ok:
        # ---------------- fused single-pass path (x read once) -------------- #
        pool_mat = jnp.asarray(np.tile(np.eye(Vp, dtype=np.float32), (T, 1)), dtype=dt)
        bcast_mat = jnp.asarray(np.tile(np.eye(Vp, dtype=np.float32), (1, T)), dtype=dt)
        lv = T * Vp
        out_flat = pl.pallas_call(
            partial(_sce_fused_kernel, t_total=T, k_taps=K, pad=pad),
            out_shape=jax.ShapeDtypeStruct((N, C, lv), dt),
            grid=(N,),
            in_specs=[
                pl.BlockSpec((1, C, lv), lambda n: (n, 0, 0)),
                pl.BlockSpec((lv, Vp), lambda n: (0, 0)),
                pl.BlockSpec((Cr, K * C), lambda n: (0, 0)),
                pl.BlockSpec((Cr, 1), lambda n: (0, 0)),
                pl.BlockSpec((C, Cr), lambda n: (0, 0)),
                pl.BlockSpec((C, 1), lambda n: (0, 0)),
                pl.BlockSpec((Vp, lv), lambda n: (0, 0)),
            ],
            out_specs=pl.BlockSpec((1, C, lv), lambda n: (n, 0, 0)),
            compiler_params=pltpu.CompilerParams(
                dimension_semantics=("parallel",),
                vmem_limit_bytes=vmem_limit),
        )(x_flat, pool_mat, w_cat, b_sp2, w_ex2, b_ex2, bcast_mat)
    else:
        # ---------------- two-stage overflow fallback ------------------------ #
        if t_tile is None:
            t_tile = _pick_t_tile(T, Vp, C, itemsize, block_budget)
        if T % t_tile != 0:
            raise ValueError(f"t_tile={t_tile} must divide T={T}")
        n_t = T // t_tile
        lv = t_tile * Vp
        pool_mat = jnp.asarray(np.tile(np.eye(Vp, dtype=np.float32), (t_tile, 1)), dtype=dt)
        bcast_mat = jnp.asarray(np.tile(np.eye(Vp, dtype=np.float32), (1, t_tile)), dtype=dt)

        scale = pl.pallas_call(
            partial(_sce_gate_kernel, n_t_blocks=n_t, t_total=T, k_taps=K, pad=pad),
            out_shape=jax.ShapeDtypeStruct((N, C, Vp), jnp.float32),
            grid=(N, n_t),
            in_specs=[
                pl.BlockSpec((1, C, lv), lambda n, t: (n, 0, t)),
                pl.BlockSpec((lv, Vp), lambda n, t: (0, 0)),
                pl.BlockSpec((Cr, K * C), lambda n, t: (0, 0)),
                pl.BlockSpec((Cr, 1), lambda n, t: (0, 0)),
                pl.BlockSpec((C, Cr), lambda n, t: (0, 0)),
                pl.BlockSpec((C, 1), lambda n, t: (0, 0)),
            ],
            out_specs=pl.BlockSpec((1, C, Vp), lambda n, t: (n, 0, 0)),
            scratch_shapes=[pltpu.VMEM((C, Vp), jnp.float32)],
            compiler_params=pltpu.CompilerParams(
                # T-blocks must stay innermost + "arbitrary" for the
                # accumulate-then-finalize temporal mean to be correct.
                dimension_semantics=("parallel", "arbitrary"),
                vmem_limit_bytes=vmem_limit),
        )(x_flat, pool_mat, w_cat, b_sp2, w_ex2, b_ex2)

        out_flat = pl.pallas_call(
            _sce_apply_kernel,
            out_shape=jax.ShapeDtypeStruct((N, C, T * Vp), dt),
            grid=(N, n_t),
            in_specs=[
                pl.BlockSpec((1, C, lv), lambda n, t: (n, 0, t)),
                pl.BlockSpec((1, C, Vp), lambda n, t: (n, 0, 0)),
                pl.BlockSpec((Vp, lv), lambda n, t: (0, 0)),
            ],
            out_specs=pl.BlockSpec((1, C, lv), lambda n, t: (n, 0, t)),
            compiler_params=pltpu.CompilerParams(
                dimension_semantics=("parallel", "parallel"),
                vmem_limit_bytes=vmem_limit),
        )(x_flat, scale, bcast_mat)

    out = out_flat.reshape(N, C, T, Vp)
    if Vp != V:
        out = out[..., :V]
    return out


def sce_reference(x, w_sp, b_sp, w_ex, b_ex):
    """Pure-JAX reference matching the PyTorch SCE.forward."""
    K = w_sp.shape[-1]
    pad = (K - 1) // 2
    pooled = jnp.mean(x, axis=2)                          # (N, C, V)
    y = lax.conv_general_dilated(pooled, w_sp, (1,), [(pad, pad)],
                                 dimension_numbers=("NCH", "OIH", "NCH"))
    y = jnp.maximum(y + b_sp[None, :, None], 0.0)
    z = lax.conv_general_dilated(y, w_ex, (1,), [(0, 0)],
                                 dimension_numbers=("NCH", "OIH", "NCH"))
    z = z + b_ex[None, :, None]
    gate = jax.nn.sigmoid(z)                              # (N, C, V)
    return x * gate[:, :, None, :] + x


if __name__ == "__main__":
    # SCE(...) — the channel/joint attention block inside TCN_GCN_unit.
    # TODO(synk): the surrounding unit_gcn/unit_tcn Conv2d + BatchNorm2d (training-mode
    # batch statistics) and frame_attention stages are left to standard XLA ops.
    def _run_case(key, N, C, T, V, redu, **kw):
        ker_jpt = V - 1 if not V % 2 else V
        Cr = max(C // redu, 1)
        kx, k1, k2, k3, k4 = jax.random.split(key, 5)
        x = jax.random.normal(kx, (N, C, T, V), jnp.float32)
        b_sp_bound = 1.0 / np.sqrt(C * ker_jpt)
        b_ex_bound = 1.0 / np.sqrt(Cr * 1)
        w_sp = jax.random.uniform(k1, (Cr, C, ker_jpt), jnp.float32, -b_sp_bound, b_sp_bound)
        b_sp = jax.random.uniform(k2, (Cr,), jnp.float32, -b_sp_bound, b_sp_bound)
        w_ex = jax.random.uniform(k3, (C, Cr, 1), jnp.float32, -b_ex_bound, b_ex_bound)
        b_ex = jax.random.uniform(k4, (C,), jnp.float32, -b_ex_bound, b_ex_bound)

        out = jax.block_until_ready(sce_forward(x, w_sp, b_sp, w_ex, b_ex, **kw))
        ref = jax.block_until_ready(sce_reference(x, w_sp, b_sp, w_ex, b_ex))
        assert out.shape == (N, C, T, V) and out.dtype == x.dtype
        np.testing.assert_allclose(np.asarray(out), np.asarray(ref), rtol=1e-4, atol=1e-5)

    key = jax.random.PRNGKey(0)
    k0, k1, k2 = jax.random.split(key, 3)

    # 1) Fused single-pass path (per-sample slab fits the block budget): x read once.
    _run_case(k0, N=2, C=32, T=32, V=8, redu=16)
    # 2) Two-stage overflow fallback with a tiled accumulate-then-finalize temporal mean
    #    (t_tile=16 -> lane width 128, two reduction steps per sample).
    _run_case(k1, N=2, C=32, T=32, V=8, redu=16, force_two_stage=True, t_tile=16)
    # 3) Joint-axis padding path (V=6 -> Vp=8), fused.
    _run_case(k2, N=1, C=32, T=16, V=6, redu=16)

    print("KERNEL_OK")
</pallas_src>

<mosaic_0001>
module attributes {stable_mosaic.version = 11 : i64} {
  func.func @_sce_fused_kernel(%arg0: i32, %arg1: memref<1x32x256xf32, #tpu.memory_space<vmem>>, %arg2: memref<256x8xf32, #tpu.memory_space<vmem>>, %arg3: memref<2x224xf32, #tpu.memory_space<vmem>>, %arg4: memref<2x1xf32, #tpu.memory_space<vmem>>, %arg5: memref<32x2xf32, #tpu.memory_space<vmem>>, %arg6: memref<32x1xf32, #tpu.memory_space<vmem>>, %arg7: memref<8x256xf32, #tpu.memory_space<vmem>>, %arg8: memref<1x32x256xf32, #tpu.memory_space<vmem>>) attributes {dimension_semantics = [#tpu.dimension_semantics<parallel>], iteration_bounds = array<i64: 2>, scalar_prefetch = 0 : i64, scratch_operands = 0 : i64, tpu.core_type = #tpu.core_type<tc>, window_params = [{transform_indices = @transform_0, window_bounds = array<i64: 1, 32, 256>}, {pipeline_mode = #tpu.pipeline_mode<synchronous>, transform_indices = @transform_1, window_bounds = array<i64: 256, 8>}, {pipeline_mode = #tpu.pipeline_mode<synchronous>, transform_indices = @transform_2, window_bounds = array<i64: 2, 224>}, {pipeline_mode = #tpu.pipeline_mode<synchronous>, transform_indices = @transform_3, window_bounds = array<i64: 2, 1>}, {pipeline_mode = #tpu.pipeline_mode<synchronous>, transform_indices = @transform_4, window_bounds = array<i64: 32, 2>}, {pipeline_mode = #tpu.pipeline_mode<synchronous>, transform_indices = @transform_5, window_bounds = array<i64: 32, 1>}, {pipeline_mode = #tpu.pipeline_mode<synchronous>, transform_indices = @transform_6, window_bounds = array<i64: 8, 256>}, {transform_indices = @transform_7, window_bounds = array<i64: 1, 32, 256>}]} {
    %c0 = arith.constant 0 : index
    %c0_0 = arith.constant 0 : index
    %c0_1 = arith.constant 0 : index
    %0 = vector.load %arg1[%c0, %c0_0, %c0_1] : memref<1x32x256xf32, #tpu.memory_space<vmem>>, vector<1x32x256xf32>
    %1 = vector.shape_cast %0 : vector<1x32x256xf32> to vector<32x256xf32>
    %c0_2 = arith.constant 0 : index
    %c0_3 = arith.constant 0 : index
    %2 = vector.load %arg2[%c0_2, %c0_3] : memref<256x8xf32, #tpu.memory_space<vmem>>, vector<256x8xf32>
    %cst = arith.constant dense<0.000000e+00> : vector<32x8xf32>
    %3 = tpu.matmul %1, %2, %cst {dimension_numbers = #tpu.dot_dimension_numbers<[1], [0], [0], [1], [0, 0, 1, 1], [], []>} : vector<32x256xf32>, vector<256x8xf32>, vector<32x8xf32> -> vector<32x8xf32>
    %cst_4 = arith.constant 3.125000e-02 : f32
    %4 = vector.broadcast %cst_4 : f32 to vector<32x8xf32>
    %5 = arith.mulf %3, %4 : vector<32x8xf32>
    %c0_5 = arith.constant 0 : index
    %c0_6 = arith.constant 0 : index
    %6 = vector.load %arg3[%c0_5, %c0_6] : memref<2x224xf32, #tpu.memory_space<vmem>>, vector<2x224xf32>
    %c0_7 = arith.constant 0 : index
    %c0_8 = arith.constant 0 : index
    %7 = vector.load %arg4[%c0_7, %c0_8] : memref<2x1xf32, #tpu.memory_space<vmem>>, vector<2x1xf32>
    %c0_9 = arith.constant 0 : index
    %c0_10 = arith.constant 0 : index
    %8 = vector.load %arg5[%c0_9, %c0_10] : memref<32x2xf32, #tpu.memory_space<vmem>>, vector<32x2xf32>
    %c0_11 = arith.constant 0 : index
    %c0_12 = arith.constant 0 : index
    %9 = vector.load %arg6[%c0_11, %c0_12] : memref<32x1xf32, #tpu.memory_space<vmem>>, vector<32x1xf32>
    %cst_13 = arith.constant 0.000000e+00 : f32
    %10 = vector.broadcast %cst_13 : f32 to vector<32x3xf32>
    %11 = vector.extract_strided_slice %5 {offsets = [0, 0], sizes = [32, 5], strides = [1, 1]} : vector<32x8xf32> to vector<32x5xf32>
    %12 = tpu.concatenate %10, %11 in 1 : vector<32x3xf32>, vector<32x5xf32> -> vector<32x8xf32>
    %cst_14 = arith.constant 0.000000e+00 : f32
    %13 = vector.broadcast %cst_14 : f32 to vector<32x2xf32>
    %14 = vector.extract_strided_slice %5 {offsets = [0, 0], sizes = [32, 6], strides = [1, 1]} : vector<32x8xf32> to vector<32x6xf32>
    %15 = tpu.concatenate %13, %14 in 1 : vector<32x2xf32>, vector<32x6xf32> -> vector<32x8xf32>
    %cst_15 = arith.constant 0.000000e+00 : f32
    %16 = vector.broadcast %cst_15 : f32 to vector<32x1xf32>
    %17 = vector.extract_strided_slice %5 {offsets = [0, 0], sizes = [32, 7], strides = [1, 1]} : vector<32x8xf32> to vector<32x7xf32>
    %18 = tpu.concatenate %16, %17 in 1 : vector<32x1xf32>, vector<32x7xf32> -> vector<32x8xf32>
    %19 = vector.extract_strided_slice %5 {offsets = [0, 1], sizes = [32, 7], strides = [1, 1]} : vector<32x8xf32> to vector<32x7xf32>
    %cst_16 = arith.constant 0.000000e+00 : f32
    %20 = vector.broadcast %cst_16 : f32 to vector<32x1xf32>
    %21 = tpu.concatenate %19, %20 in 1 : vector<32x7xf32>, vector<32x1xf32> -> vector<32x8xf32>
    %22 = vector.extract_strided_slice %5 {offsets = [0, 2], sizes = [32, 6], strides = [1, 1]} : vector<32x8xf32> to vector<32x6xf32>
    %cst_17 = arith.constant 0.000000e+00 : f32
    %23 = vector.broadcast %cst_17 : f32 to vector<32x2xf32>
    %24 = tpu.concatenate %22, %23 in 1 : vector<32x6xf32>, vector<32x2xf32> -> vector<32x8xf32>
    %25 = vector.extract_strided_slice %5 {offsets = [0, 3], sizes = [32, 5], strides = [1, 1]} : vector<32x8xf32> to vector<32x5xf32>
    %cst_18 = arith.constant 0.000000e+00 : f32
    %26 = vector.broadcast %cst_18 : f32 to vector<32x3xf32>
    %27 = tpu.concatenate %25, %26 in 1 : vector<32x5xf32>, vector<32x3xf32> -> vector<32x8xf32>
    %28 = tpu.concatenate %12, %15, %18, %5, %21, %24, %27 in 0 : vector<32x8xf32>, vector<32x8xf32>, vector<32x8xf32>, vector<32x8xf32>, vector<32x8xf32>, vector<32x8xf32>, vector<32x8xf32> -> vector<224x8xf32>
    %cst_19 = arith.constant dense<0.000000e+00> : vector<2x8xf32>
    %29 = tpu.matmul %6, %28, %cst_19 {dimension_numbers = #tpu.dot_dimension_numbers<[1], [0], [0], [1], [0, 0, 1, 1], [], []>} : vector<2x224xf32>, vector<224x8xf32>, vector<2x8xf32> -> vector<2x8xf32>
    %30 = vector.broadcast %7 : vector<2x1xf32> to vector<2x8xf32>
    %31 = arith.addf %29, %30 : vector<2x8xf32>
    %cst_20 = arith.constant 0.000000e+00 : f32
    %32 = vector.broadcast %cst_20 : f32 to vector<2x8xf32>
    %33 = arith.maximumf %31, %32 : vector<2x8xf32>
    %cst_21 = arith.constant dense<0.000000e+00> : vector<32x8xf32>
    %34 = tpu.matmul %8, %33, %cst_21 {dimension_numbers = #tpu.dot_dimension_numbers<[1], [0], [0], [1], [0, 0, 1, 1], [], []>} : vector<32x2xf32>, vector<2x8xf32>, vector<32x8xf32> -> vector<32x8xf32>
    %35 = vector.broadcast %9 : vector<32x1xf32> to vector<32x8xf32>
    %36 = arith.addf %34, %35 : vector<32x8xf32>
    %37 = arith.negf %36 : vector<32x8xf32>
    %38 = math.exp %37 : vector<32x8xf32>
    %cst_22 = arith.constant 1.000000e+00 : f32
    %39 = vector.broadcast %cst_22 : f32 to vector<32x8xf32>
    %40 = arith.addf %39, %38 : vector<32x8xf32>
    %41 = arith.divf %39, %40 : vector<32x8xf32>
    %cst_23 = arith.constant 1.000000e+00 : f32
    %42 = vector.broadcast %cst_23 : f32 to vector<32x8xf32>
    %43 = arith.addf %42, %41 : vector<32x8xf32>
    %c0_24 = arith.constant 0 : index
    %c0_25 = arith.constant 0 : index
    %44 = vector.load %arg7[%c0_24, %c0_25] : memref<8x256xf32, #tpu.memory_space<vmem>>, vector<8x256xf32>
    %cst_26 = arith.constant dense<0.000000e+00> : vector<32x256xf32>
    %45 = tpu.matmul %43, %44, %cst_26 {dimension_numbers = #tpu.dot_dimension_numbers<[1], [0], [0], [1], [0, 0, 1, 1], [], []>} : vector<32x8xf32>, vector<8x256xf32>, vector<32x256xf32> -> vector<32x256xf32>
    %46 = arith.mulf %1, %45 : vector<32x256xf32>
    %c0_27 = arith.constant 0 : index
    %c0_28 = arith.constant 0 : index
    %c0_29 = arith.constant 0 : index
    %47 = vector.load %arg8[%c0_27, %c0_28, %c0_29] : memref<1x32x256xf32, #tpu.memory_space<vmem>>, vector<1x32x256xf32>
    %48 = vector.shape_cast %47 : vector<1x32x256xf32> to vector<32x256xf32>
    %49 = vector.shape_cast %46 : vector<32x256xf32> to vector<1x32x256xf32>
    tpu.vector_store %arg8[%c0_27, %c0_28, %c0_29], %49 {strides = array<i32>} : memref<1x32x256xf32, #tpu.memory_space<vmem>>, vector<1x32x256xf32>,
    return
  }
  func.func @transform_0(%arg0: i32) -> (i32, i32, i32) {
    %c0_i32 = arith.constant 0 : i32
    %c0_i32_0 = arith.constant 0 : i32
    %c0_i32_1 = arith.constant 0 : i32
    return %arg0, %c0_i32, %c0_i32_0 : i32, i32, i32
  }
  func.func @transform_1(%arg0: i32) -> (i32, i32) {
    %c0_i32 = arith.constant 0 : i32
    %c0_i32_0 = arith.constant 0 : i32
    %c0_i32_1 = arith.constant 0 : i32
    return %c0_i32, %c0_i32_0 : i32, i32
  }
  func.func @transform_2(%arg0: i32) -> (i32, i32) {
    %c0_i32 = arith.constant 0 : i32
    %c0_i32_0 = arith.constant 0 : i32
    %c0_i32_1 = arith.constant 0 : i32
    return %c0_i32, %c0_i32_0 : i32, i32
  }
  func.func @transform_3(%arg0: i32) -> (i32, i32) {
    %c0_i32 = arith.constant 0 : i32
    %c0_i32_0 = arith.constant 0 : i32
    %c0_i32_1 = arith.constant 0 : i32
    return %c0_i32, %c0_i32_0 : i32, i32
  }
  func.func @transform_4(%arg0: i32) -> (i32, i32) {
    %c0_i32 = arith.constant 0 : i32
    %c0_i32_0 = arith.constant 0 : i32
    %c0_i32_1 = arith.constant 0 : i32
    return %c0_i32, %c0_i32_0 : i32, i32
  }
  func.func @transform_5(%arg0: i32) -> (i32, i32) {
    %c0_i32 = arith.constant 0 : i32
    %c0_i32_0 = arith.constant 0 : i32
    %c0_i32_1 = arith.constant 0 : i32
    return %c0_i32, %c0_i32_0 : i32, i32
  }
  func.func @transform_6(%arg0: i32) -> (i32, i32) {
    %c0_i32 = arith.constant 0 : i32
    %c0_i32_0 = arith.constant 0 : i32
    %c0_i32_1 = arith.constant 0 : i32
    return %c0_i32, %c0_i32_0 : i32, i32
  }
  func.func @transform_7(%arg0: i32) -> (i32, i32, i32) {
    %c0_i32 = arith.constant 0 : i32
    %c0_i32_0 = arith.constant 0 : i32
    %c0_i32_1 = arith.constant 0 : i32
    return %arg0, %c0_i32, %c0_i32_0 : i32, i32, i32
  }
}

</mosaic_0001>

<bundles_post_ra>
// kernel: tpu_custom_call.1
= control target key start
LH: loop header
LB: loop body
LE: loop exit
PB: predicated region body
PF: predicated region fallthrough
CT: control target
= control target key end

     0   :  { %12 = vsyncpa [#allocation3], 0  ;;  %s1749_s0 = inlined_call_operand.vmem [shape: f32[2,32,256], index: 0, kind: input, shape index: {}]   ;;  %s1750_s1 = inlined_call_operand.vmem [shape: f32[256,8], index: 1, kind: input, shape index: {}]   ;;  %s1751_s2 = inlined_call_operand.vmem [shape: f32[2,224], index: 2, kind: input, shape index: {}]   ;;  %s1752_s3 = inlined_call_operand.vmem [shape: f32[2,1], index: 3, kind: input, shape index: {}]   ;;  %s1753_s4 = inlined_call_operand.vmem [shape: f32[32,2], index: 4, kind: input, shape index: {}]   ;;  %s1754_s5 = inlined_call_operand.vmem [shape: f32[32,1], index: 5, kind: input, shape index: {}]   ;;  %s1755_s6 = inlined_call_operand.vmem [shape: f32[8,256], index: 6, kind: input, shape index: {}]   ;;  %s1756_s7 = inlined_call_operand.hbm [shape: f32[2,32,256], index: 7, kind: output, shape index: {}]  }
   0x1   :  { %14 = vsyncpa [#allocation3 + $0x1], 0  ;;  %s1408_s24 = smov 0   ;;  %s1410_s25 = smov 0  }
   0x2   :  { %s1412_s26 = smov 0   ;;  %s1414_s27 = smov 0  }
   0x3 LB: > { %s1429_s28 = sadd.s32 4294967295, %s1354_s27   ;;  %s956_s29 = sadd.s32 4294967294, %s1354_s27   ;;  %s1354_s27 = sphi %s1414_s27, %s1766_s27   ;;  %s1350_s26 = sphi %s1412_s26, %s1765_s26   ;;  %s1346_s25 = sphi %s1410_s25, %s1764_s25   ;;  %s1342_s24 = sphi %s1408_s24, %s1763_s24  }
   0x4   : > { %s1433_s30 = sadd.s32 1, %s1354_s27   ;;  %s179_s8 = sadd.s32 1, %s1350_s26 }
   0x5   : > { %s176_s9 = ssub.s32 %s1354_s27, %s1433_s30  ;;  %p189_p0 = scmp.ne.s32.totalorder %s1350_s26, %s1346_s25 }
   0x6   : > { %p177_p1 = scmp.eq.s32.totalorder %s176_s9, 0  ;;  %p190_p2 = scmp.eq.s32.totalorder %s1429_s28, 1 }
   0x7   : > { %p195_p3 = scmp.ne.s32.totalorder %s1346_s25, %s1342_s24  ;;  %p196_p4 = scmp.eq.s32.totalorder %s956_s29, 1 }
   0x8   : > { %s1444_s10 = scalar_select %p177_p1, %s1350_s26, %s179_s8  }
   0x9   : > { %p1446_p5 = por %p190_p2, %p189_p0  ;;  %p1450_p6 = por %p196_p4, %p195_p3 }
   0xa   : > { %p959_p7 = scmp.ge.s32.totalorder %s1354_s27, 1  ;;  %p240_p8 = scmp.lt.s32.totalorder %s1354_s27, 3 }
   0xc   : > { %p241_p9 = pnand %p959_p7, %p240_p8 }
   0xd   : > { %v301_v0 = vld [vmem:[%s1750_s1 + $0x80] sm:$0xff] (!%p241_p9)  ;;  %v302_v1 = vld [vmem:[%s1750_s1 + $0x88] sm:$0xff] (!%p241_p9)  ;;  %p272_p10 = scmp.lt.s32.totalorder (!%p241_p9), %s1429_s28, 1  ;;  %v303_v5 = vld [vmem:[%s1750_s1 + $0x90] sm:$0xff] (!%p241_p9)  ;;  %v1356_v59 = vmov (!%p241_p9), 0.0|0.0   ;;  %s1358_s14 = smov (!%p241_p9), 3  }
   0xe   : > { %244 = sbr.rel (%p241_p9) target bundleno = 1152 (0x480), region = 48  ;;  %v285_v2 = vld [vmem:[%s1750_s1] sm:$0xff] (!%p241_p9)  ;;  %v1078_v3 = vpack.c.bf16 (!%p241_p9), %v302_v1, %v301_v0  ;;  %v286_v4 = vld [vmem:[%s1750_s1 + $0x8] sm:$0xff] (!%p241_p9)  ;;  %v304_v6 = vld [vmem:[%s1750_s1 + $0x98] sm:$0xff] (!%p241_p9)  ;;  %1110 = vmatprep.subr.bf16.mxu1 (!%p241_p9), %v1356_v59  ;;  %s1359_s15 = smov (!%p241_p9), 1   ;;  %vm537_vm0 = vcmask (!%p241_p9), 785408  }
   0xf   : > { %v1080_v7 = vpack.c.bf16 (!%p241_p9), %v286_v4, %v285_v2  ;;  %v1082_v8 = vpack.c.bf16 (!%p241_p9), %v304_v6, %v303_v5  ;;  %v287_v9 = vld [vmem:[%s1750_s1 + $0x10] sm:$0xff] (!%p241_p9)  ;;  %v288_v10 = vld [vmem:[%s1750_s1 + $0x18] sm:$0xff] (!%p241_p9)  ;;  %v305_v11 = vld [vmem:[%s1750_s1 + $0xa0] sm:$0xff] (!%p241_p9)  ;;  %s1360_s16 = smov (!%p241_p9), 127   ;;  %s1361_s18 = smov (!%p241_p9), 126   ;;  %vm432_vm1 = vcmask (!%p241_p9), 23552  }
  0x10   : > { %1079 = vmatprep.subr.bf16.mxu0 (!%p241_p9), %v1078_v3  ;;  %v306_v12 = vld [vmem:[%s1750_s1 + $0xa8] sm:$0xff] (!%p241_p9)  ;;  %v1084_v13 = vpack.c.bf16 (!%p241_p9), %v288_v10, %v287_v9  ;;  %v289_v15 = vld [vmem:[%s1750_s1 + $0x20] sm:$0xff] (!%p241_p9)  ;;  %v307_v17 = vld [vmem:[%s1750_s1 + $0xb0] sm:$0xff] (!%p241_p9)  ;;  %s1362_s19 = smov (!%p241_p9), 125   ;;  %vm449_vm4 = vcmask (!%p241_p9), 15360   ;;  %vm466_vm7 = vcmask (!%p241_p9), 7168  }
  0x11   : > { %1081 = vmatpush3.bf16.msra.mxu0 (!%p241_p9), %v1080_v7  ;;  %v1086_v14 = vpack.c.bf16 (!%p241_p9), %v306_v12, %v305_v11  ;;  %v290_v16 = vld [vmem:[%s1750_s1 + $0x28] sm:$0xff] (!%p241_p9)  ;;  %v308_v18 = vld [vmem:[%s1750_s1 + $0xb8] sm:$0xff] (!%p241_p9)  ;;  %v291_v21 = vld [vmem:[%s1750_s1 + $0x30] sm:$0xff] (!%p241_p9)  ;;  %vm483_vm10 = vcmask (!%p241_p9), 56320   ;;  %vm500_vm12 = vcmask (!%p241_p9), 48128   ;;  %vm517_vm14 = vcmask (!%p241_p9), 39936  }
  0x12   : > { %1083 = vmatprep.subr.bf16.mxu0 (!%p241_p9), %v1082_v8  ;;  %v1088_v19 = vpack.c.bf16 (!%p241_p9), %v290_v16, %v289_v15  ;;  %v1090_v20 = vpack.c.bf16 (!%p241_p9), %v308_v18, %v307_v17  ;;  %v292_v22 = vld [vmem:[%s1750_s1 + $0x38] sm:$0xff] (!%p241_p9)  ;;  %v309_v23 = vld [vmem:[%s1750_s1 + $0xc0] sm:$0xff] (!%p241_p9)  ;;  %v310_v24 = vld [vmem:[%s1750_s1 + $0xc8] sm:$0xff] (!%p241_p9)  ;;  %v1363_v16 = vmov (!%p241_p9), 0  }
  0x13   : > { %v1092_v26 = vpack.c.bf16 (!%p241_p9), %v292_v22, %v291_v21  ;;  %v1094_v27 = vpack.c.bf16 (!%p241_p9), %v310_v24, %v309_v23  ;;  %v293_v28 = vld [vmem:[%s1750_s1 + $0x40] sm:$0xff] (!%p241_p9)  ;;  %v294_v29 = vld [vmem:[%s1750_s1 + $0x48] sm:$0xff] (!%p241_p9)  ;;  %v311_v30 = vld [vmem:[%s1750_s1 + $0xd0] sm:$0xff] (!%p241_p9)  ;;  %1274 = vset.pattern.permute.xlu0 (!%p241_p9), %v1363_v16  ;;  %1275 = vset.pattern.permute.xlu1 (!%p241_p9), %v1363_v16 }
  0x14   : > { %v312_v31 = vld [vmem:[%s1750_s1 + $0xd8] sm:$0xff] (!%p241_p9)  ;;  %v1096_v32 = vpack.c.bf16 (!%p241_p9), %v294_v29, %v293_v28  ;;  %v295_v34 = vld [vmem:[%s1750_s1 + $0x50] sm:$0xff] (!%p241_p9)  ;;  %v313_v36 = vld [vmem:[%s1750_s1 + $0xe0] sm:$0xff] (!%p241_p9) }
  0x15   : > { %s273_s17 = scalar_select %p272_p10, %s1429_s28, 1  ;;  %1085 = vmatpush3.bf16.msra.mxu0 %v1084_v13  ;;  %v1098_v33 = vpack.c.bf16 %v312_v31, %v311_v30  ;;  %v296_v35 = vld [vmem:[%s1750_s1 + $0x58] sm:$0xff]  ;;  %v314_v37 = vld [vmem:[%s1750_s1 + $0xe8] sm:$0xff]  ;;  %v297_v40 = vld [vmem:[%s1750_s1 + $0x60] sm:$0xff] }
  0x16   : > { %1087 = vmatprep.subr.bf16.mxu0 %v1086_v14  ;;  %v1100_v38 = vpack.c.bf16 %v296_v35, %v295_v34  ;;  %v1102_v39 = vpack.c.bf16 %v314_v37, %v313_v36  ;;  %v298_v41 = vld [vmem:[%s1750_s1 + $0x68] sm:$0xff]  ;;  %v315_v42 = vld [vmem:[%s1750_s1 + $0xf0] sm:$0xff]  ;;  %v316_v43 = vld [vmem:[%s1750_s1 + $0xf8] sm:$0xff] }
  0x17   : > { %s1019_s20 = sshll.u32 %s273_s17, 6  ;;  %v1104_v44 = vpack.c.bf16 %v298_v41, %v297_v40  ;;  %v1106_v45 = vpack.c.bf16 %v316_v43, %v315_v42  ;;  %v299_v46 = vld [vmem:[%s1750_s1 + $0x70] sm:$0xff]  ;;  %v300_v47 = vld [vmem:[%s1750_s1 + $0x78] sm:$0xff]  ;;  %v407_v15 = vld [vmem:[%s1752_s3] sm:$0x3] }
  0x18   : > { %s1503_s17 = scalar_lea.vmem %s1749_s0, %s1019_s20  ;;  %v1108_v48 = vpack.c.bf16 %v300_v47, %v299_v46  ;;  %v1611_v13 = vld.sshfl [vmem:[%s1751_s2] sm:$0x33 pattern:$0x76325410]  ;;  %v414_v17 = vld [vmem:[%s1754_s5 + $0x10] sm:$0xff]  ;;  %vm1621_vm2 = vmneg %vm432_vm1  ;;  %vm762_vm1 = vcmask 64512  }
  0x19   : > { %v1518_v25 = vld [vmem:[%s1503_s17 + $0x8] sm:$0xff]  ;;  %1089 = vmatpush3.bf16.msra.mxu0 %v1088_v19  ;;  %v1564_v49 = vld [vmem:[%s1503_s17] sm:$0xff]  ;;  %v1567_v50 = vld [vmem:[%s1503_s17 + $0x18] sm:$0xff]  ;;  %v535_v14 = vcombine.high %v1611_v13, %v1611_v13  ;;  %s1365_s20 = smov [#allocation2]  }
  0x1a   : > { %381 = vmatprep.mubr.f32.mxu0 %v1518_v25  ;;  %1091 = vmatprep.subr.bf16.mxu0 %v1090_v20  ;;  %v1572_v51 = vld [vmem:[%s1503_s17 + $0x10] sm:$0xff]  ;;  %v1575_v52 = vld [vmem:[%s1503_s17 + $0x28] sm:$0xff]  ;;  %v1580_v53 = vld [vmem:[%s1503_s17 + $0x20] sm:$0xff]  ;;  %s1296_s9 = sshll.u32 %s1365_s20, 4  ;;  %s1297_s9 = int_to_ptr.vmem [resolvable:$false] %s1296_s9 }
  0x1b   : > { %v1583_v54 = vld [vmem:[%s1503_s17 + $0x38] sm:$0xff]  ;;  %v1588_v55 = vld [vmem:[%s1503_s17 + $0x30] sm:$0xff]  ;;  %s1357_s17 = smov 2   ;;  %1000 = vmatprep.mubr.msk.f32.mxu1 %vm537_vm0, %v535_v14  ;;  %vm1112_vm3 = vmpackc.low %vm1621_vm2, %vm1621_vm2  ;;  %vm643_vm0 = vcmask 1041408   ;;  %s1298_s13 = scalar_lea.vmem %s1297_s9, 2048 }
  0x1c   : > { %vm1630_vm5 = vmneg %vm449_vm4  ;;  %v408_v14 = vld [vmem:[%s1753_s4] sm:$0xff]  ;;  %v413_v16 = vld [vmem:[%s1754_s5 + $0x8] sm:$0xff] }
  0x1d   : > { %1093 = vmatpush3.bf16.msra.mxu0 %v1092_v26  ;;  %vm1120_vm6 = vmpackc.low %vm1630_vm5, %vm1630_vm5 }
  0x1e   : > { %1095 = vmatprep.subr.bf16.mxu0 %v1094_v27  ;;  %vm980_vm8 = vmneg %vm466_vm7 }
  0x1f   : > { %vm1128_vm9 = vmpackc.low %vm980_vm8, %vm980_vm8 }
  0x20   : > { %vm1142_vm11 = vmpackc.low %vm483_vm10, %vm483_vm10 }
  0x21   : > { %1097 = vmatpush3.bf16.msra.mxu0 %v1096_v32  ;;  %vm1150_vm13 = vmpackc.low %vm500_vm12, %vm500_vm12 }
  0x22   : > { %1099 = vmatprep.subr.bf16.mxu0 %v1098_v33  ;;  %vm1158_vm15 = vmpackc.low %vm517_vm14, %vm517_vm14 }
  0x25   : > { %1101 = vmatpush3.bf16.msra.mxu0 %v1100_v38 }
  0x26   : > { %1103 = vmatprep.subr.bf16.mxu0 %v1102_v39 }
  0x29   : > { %1105 = vmatpush3.bf16.msra.mxu0 %v1104_v44 }
  0x2a   : > { %1107 = vmatprep.subr.bf16.mxu0 %v1106_v45 }
  0x2d   : > { %1109 = vmatpush3.bf16.msra.mxu0 %v1108_v48 }
  0x30   : > { %382 = vmatmul.mubr.f32.vlgmr.msra.gmra.mrb[0].mxu0 %v1564_v49 }
  0x31   : > { %386 = vmatprep.mubr.f32.mxu0 %v1567_v50 }
  0x34   : > { %387 = vmatmul.mubr.f32.gmra.mrb[2].mxu0 %v1572_v51 }
  0x35   : > { %391 = vmatprep.mubr.f32.mxu0 %v1575_v52 }
  0x38   : > { %392 = vmatmul.mubr.f32.gmra.mrb[4].mxu0 %v1580_v53 }
  0x39   : > { %396 = vmatprep.mubr.f32.mxu0 %v1583_v54 }
  0x3c   : > { %397 = vmatmul.mubr.f32.gmra.mrb[6].mxu0 %v1588_v55 }
 0x103   : > { %v1053_v56 = vpop.f32.mrb[0].mxu0 }
 0x104   : > { %v1054_v57 = vpop.f32.mrb[1].mxu0 }
 0x105   : > { %v1055_v58 = vadd.f32 %v1054_v57, %v1053_v56 }
 0x107   : > { %v1056_v60 = vpop.f32.mrb[2].mxu0  ;;  %v1592_v63 = vmul.f32 0.03125, %v1055_v58 }
 0x108   : > { %v1057_v61 = vpop.f32.mrb[3].mxu0 }
 0x109   : > { %v1058_v62 = vadd.f32 %v1057_v61, %v1056_v60 }
 0x10b   : > { %v1594_v0 = vmul.f32 0.03125, %v1058_v62  ;;  %v1059_v1 = vpop.f32.mrb[4].mxu0 }
 0x10c   : > { %v1060_v2 = vpop.f32.mrb[5].mxu0 }
 0x10d   : > { %v1061_v3 = vadd.f32 %v1060_v2, %v1059_v1  ;;  %v1224_v4 = vpack.i.bf16 %v1594_v0, %v1592_v63  ;;  %v1135_v5 = vpack.c.bf16 %v1594_v0, %v1592_v63 }
 0x10f   : > { %v1062_v6 = vpop.f32.mrb[6].mxu0  ;;  %1225 = vrot.lane.b32.xlu1 %v1224_v4, %s1357_s17  ;;  %1215 = vrot.lane.b32.xlu0 %v1224_v4, %s1358_s14  ;;  %v1600_v9 = vmul.f32 0.03125, %v1061_v3 }
 0x110   : > { %v1063_v7 = vpop.f32.mrb[7].mxu0 }
 0x111   : > { %v1064_v8 = vadd.f32 %v1063_v7, %v1062_v6 }
 0x113   : > { %v1602_v10 = vmul.f32 0.03125, %v1064_v8 }
 0x115   : > { %v1229_v11 = vpack.i.bf16 %v1602_v10, %v1600_v9  ;;  %v1138_v12 = vpack.c.bf16 %v1602_v10, %v1600_v9 }
 0x117   : > { %1230 = vrot.lane.b32.xlu1 %v1229_v11, %s1357_s17  ;;  %1220 = vrot.lane.b32.xlu0 %v1229_v11, %s1358_s14 }
 0x11b   : > { %1240 = vrot.lane.b32.xlu1 %v1229_v11, %s1359_s15  ;;  %1235 = vrot.lane.b32.xlu0 %v1224_v4, %s1359_s15  ;;  %s269_s15 = sand.u32 1, %s1346_s25  }
 0x11f   : > { %1250 = vrot.lane.b32.xlu1 %v1229_v11, %s1360_s16  ;;  %1245 = vrot.lane.b32.xlu0 %v1224_v4, %s1360_s16  ;;  %s960_s16 = sshll.u32 %s269_s15, 6 }
 0x123   : > { %1260 = vrot.lane.b32.xlu1 %v1229_v11, %s1361_s18  ;;  %1255 = vrot.lane.b32.xlu0 %v1224_v4, %s1361_s18  ;;  %s271_s18 = scalar_lea.vmem [#allocation2], %s960_s16 }
 0x124   : > { %s894_s21 = sshll.u32 %s271_s18, 4  ;;  %s1703_s21 = int_to_ptr.vmem [resolvable:$true] %s894_s21 }
 0x125   : > { %s1292_s8 = scalar_lea.vmem %s1703_s21, 1024  ;;  %p1299_p0 = scmp.lt.s32.totalorder %s1703_s21, %s1297_s9 }
 0x126   : > { %p1293_p11 = scmp.ne.s32.totalorder %s1703_s21, %s1292_s8  ;;  %p1300_p1 = scmp.lt.s32.totalorder %s1298_s13, %s1292_s8 }
 0x127   : > { %1270 = vrot.lane.b32.xlu1 %v1229_v11, %s1362_s19  ;;  %1265 = vrot.lane.b32.xlu0 %v1224_v4, %s1362_s19  ;;  %s1020_s19 = sshll.u32 %s1429_s28, 10  ;;  %s1708_s28 = scalar_lea.sflag [#allocation3], %s269_s15 }
 0x128   : > { %s1701_s29 = scalar_lea.hbm %s1756_s7, %s1020_s19  ;;  %p1294_p12 = pnand %p1293_p11, %p1446_p5 }
 0x129   : > { %p1301_p2 = por %p1300_p1, %p1299_p0 }
 0x12a   : > { %p1295_p13 = pneg %p1294_p12 }
 0x12b   : > { %524 = vperm.xlu0 %1274, %v407_v15   ;;  %v412_v15 = vld [vmem:[%s1754_s5] sm:$0xff] }
 0x12c   : > { %613 = vperm.xlu1 %1275, %v412_v15   ;;  %p1302_p3 = pnand %p1301_p2, %p1295_p13 }
 0x12f   : > { %623 = vperm.xlu0 %1274, %v414_v17  }
 0x130   : > { %618 = vperm.xlu1 %1275, %v413_v16  }
 0x181   : > { %v1216_v19 = vpop.permute.xlu0 %1215  ;;  %v1226_v23 = vpop.permute.xlu1 %1225 }
 0x182   : > { %v1218_v20 = vunpack.i.h.bf16 %v1216_v19  ;;  %v1217_v21 = vunpack.i.l.bf16 %v1216_v19  ;;  %v1228_v28 = vunpack.i.h.bf16 %v1226_v23  ;;  %v1227_v29 = vunpack.i.l.bf16 %v1226_v23  ;;  %v411_v23 = vld [vmem:[%s1753_s4 + $0x18] sm:$0xff] }
 0x184   : > { %v1111_v22 = vpack.c.bf16 %v1218_v20, %v1217_v21  ;;  %v1119_v33 = vpack.c.bf16 %v1228_v28, %v1227_v29  ;;  %v409_v21 = vld [vmem:[%s1753_s4 + $0x8] sm:$0xff] }
 0x186   : > { %1113 = vmatpush1.bf16.msk.msra.mxu1 %vm1112_vm3, %v1111_v22  ;;  %v410_v22 = vld [vmem:[%s1753_s4 + $0x10] sm:$0xff] }
 0x187   : > { %1114 = vmatprep.subr.bf16.mxu1 %v1356_v59 }
 0x189   : > { %v1221_v24 = vpop.permute.xlu0 %1220  ;;  %v1231_v32 = vpop.permute.xlu1 %1230 }
 0x18a   : > { %v1223_v26 = vunpack.i.h.bf16 %v1221_v24  ;;  %v1222_v27 = vunpack.i.l.bf16 %v1221_v24  ;;  %v1233_v34 = vunpack.i.h.bf16 %v1231_v32  ;;  %v1232_v35 = vunpack.i.l.bf16 %v1231_v32  ;;  %v761_v24 = vld [vmem:[%s1755_s6 + $0x8] sm:$0xff] }
 0x18b   : > { %775 = vmatprep.subr.mxu0 %v761_v24 }
 0x18c   : > { %v1115_v30 = vpack.c.bf16 %v1223_v26, %v1222_v27  ;;  %v1123_v37 = vpack.c.bf16 %v1233_v34, %v1232_v35  ;;  %v760_v26 = vld [vmem:[%s1755_s6] sm:$0xff]  ;;  %v1364_v27 = vmov 0.0  }
 0x18d   : > { %v1236_v36 = vpop.permute.xlu0 %1235  ;;  %v1241_v40 = vpop.permute.xlu1 %1240  ;;  %839 = vmatprep.mubr.f32.mxu0 %v1364_v27  ;;  %776 = vmatpush1.msra.mxu0 %v760_v26 }
 0x18e   : > { %1117 = vmatpush1.bf16.msk.msra.mxu1 %vm1112_vm3, %v1115_v30  ;;  %v1238_v38 = vunpack.i.h.bf16 %v1236_v36  ;;  %v1237_v39 = vunpack.i.l.bf16 %v1236_v36  ;;  %v1243_v41 = vunpack.i.h.bf16 %v1241_v40  ;;  %v1242_v42 = vunpack.i.l.bf16 %v1241_v40 }
 0x18f   : > { %1118 = vmatprep.subr.bf16.mxu1 %v1356_v59 }
 0x190   : > { %v1127_v43 = vpack.c.bf16 %v1238_v38, %v1237_v39  ;;  %v1131_v44 = vpack.c.bf16 %v1243_v41, %v1242_v42 }
 0x191   : > { %v1246_v45 = vpop.permute.xlu0 %1245  ;;  %v1251_v48 = vpop.permute.xlu1 %1250 }
 0x192   : > { %1121 = vmatpush1.bf16.msk.msra.mxu1 %vm1120_vm6, %v1119_v33  ;;  %v1248_v46 = vunpack.i.h.bf16 %v1246_v45  ;;  %v1247_v47 = vunpack.i.l.bf16 %v1246_v45  ;;  %v1253_v56 = vunpack.i.h.bf16 %v1251_v48  ;;  %v1252_v57 = vunpack.i.l.bf16 %v1251_v48 }
 0x193   : > { %1122 = vmatprep.subr.bf16.mxu1 %v1356_v59 }
 0x194   : > { %v1141_v58 = vpack.c.bf16 %v1248_v46, %v1247_v47  ;;  %v1145_v61 = vpack.c.bf16 %v1253_v56, %v1252_v57 }
 0x195   : > { %v1256_v60 = vpop.permute.xlu0 %1255  ;;  %v1261_v0 = vpop.permute.xlu1 %1260 }
 0x196   : > { %1125 = vmatpush1.bf16.msk.msra.mxu1 %vm1120_vm6, %v1123_v37  ;;  %v1258_v62 = vunpack.i.h.bf16 %v1256_v60  ;;  %v1257_v63 = vunpack.i.l.bf16 %v1256_v60  ;;  %v1263_v1 = vunpack.i.h.bf16 %v1261_v0  ;;  %v1262_v2 = vunpack.i.l.bf16 %v1261_v0 }
 0x197   : > { %1126 = vmatprep.subr.bf16.mxu1 %v1356_v59 }
 0x198   : > { %v1149_v3 = vpack.c.bf16 %v1258_v62, %v1257_v63 }
 0x199   : > { %v1266_v4 = vpop.permute.xlu0 %1265  ;;  %v1271_v8 = vpop.permute.xlu1 %1270 }
 0x19a   : > { %1129 = vmatpush1.bf16.msk.msra.mxu1 %vm1128_vm9, %v1127_v43  ;;  %v1268_v6 = vunpack.i.h.bf16 %v1266_v4  ;;  %v1267_v7 = vunpack.i.l.bf16 %v1266_v4  ;;  %v1273_v9 = vunpack.i.h.bf16 %v1271_v8  ;;  %v1272_v10 = vunpack.i.l.bf16 %v1271_v8 }
 0x19b   : > { %1130 = vmatprep.subr.bf16.mxu1 %v1356_v59 }
 0x19c   : > { %v1157_v11 = vpack.c.bf16 %v1268_v6, %v1267_v7 }
 0x19e   : > { %1133 = vmatpush1.bf16.msk.msra.mxu1 %vm1128_vm9, %v1131_v44 }
 0x19f   : > { %1134 = vmatprep.subr.bf16.mxu1 %v1356_v59 }
 0x1a2   : > { %1136 = vmatpush1.bf16.msra.mxu1 %v1135_v5  ;;  %v1153_v5 = vpack.c.bf16 %v1263_v1, %v1262_v2 }
 0x1a3   : > { %1137 = vmatprep.subr.bf16.mxu1 %v1356_v59 }
 0x1a6   : > { %1139 = vmatpush1.bf16.msra.mxu1 %v1138_v12  ;;  %v1161_v12 = vpack.c.bf16 %v1273_v9, %v1272_v10 }
 0x1a7   : > { %1140 = vmatprep.subr.bf16.mxu1 %v1356_v59 }
 0x1aa   : > { %1143 = vmatpush1.bf16.msk.msra.mxu1 %vm1142_vm11, %v1141_v58 }
 0x1ab   : > { %1144 = vmatprep.subr.bf16.mxu1 %v1356_v59  ;;  %v614_v28 = vpop.permute.xlu1 %613 }
 0x1ae   : > { %1147 = vmatpush1.bf16.msk.msra.mxu1 %vm1142_vm11, %v1145_v61 }
 0x1af   : > { %1148 = vmatprep.subr.bf16.mxu1 %v1356_v59  ;;  %v619_v29 = vpop.permute.xlu1 %618 }
 0x1b2   : > { %1151 = vmatpush1.bf16.msk.msra.mxu1 %vm1150_vm13, %v1149_v3 }
 0x1b3   : > { %1152 = vmatprep.subr.bf16.mxu1 %v1356_v59 }
 0x1b6   : > { %1155 = vmatpush1.bf16.msk.msra.mxu1 %vm1150_vm13, %v1153_v5 }
 0x1b7   : > { %1156 = vmatprep.subr.bf16.mxu1 %v1356_v59 }
 0x1ba   : > { %1159 = vmatpush1.bf16.msk.msra.mxu1 %vm1158_vm15, %v1157_v11 }
 0x1bb   : > { %1160 = vmatprep.subr.bf16.mxu1 %v1356_v59  ;;  %v415_v59 = vld [vmem:[%s1754_s5 + $0x18] sm:$0xff] }
 0x1bc   : > { %628 = vperm.xlu1 %1275, %v415_v59  }
 0x1be   : > { %1163 = vmatpush1.bf16.msk.msra.mxu1 %vm1158_vm15, %v1161_v12 }
 0x1c1   : > { %605 = vmatmul.mubr.f32.vlgmr.msra.gmra.mrb[0].mxu1 %v1611_v13  ;;  %v525_v13 = vpop.permute.xlu0 %524 }
 0x1c2   : > { %1072 = vmatprep.mubr.msk.f32.mxu1 %vm449_vm4, %v408_v14 }
 0x1c5   : > { %v624_v38 = vpop.permute.xlu0 %623 }
 0x23b   : > { %v629_v36 = vpop.permute.xlu1 %628 }
 0x294   : > { %v606_v17 = vpop.f32.mrb[0].mxu1 }
 0x295   : > { %v607_v18 = vadd.f32 %v606_v17, %v525_v13  ;;  %v608_v19 = vpop.f32.mrb[1].mxu1 }
 0x297   : > { %v610_v20 = vmax.f32 %v607_v18, 0.0 }
 0x299   : > { %1070 = vmatprep.subr.msk.mxu1 %vm643_vm0, %v610_v20 }
 0x29a   : > { %1071 = vmatpush3.msk.msra.mxu1 %vm643_vm0, %v610_v20 }
 0x29b   : > { %1073 = vmatmul.mubr.msk.f32.vlgmr.msra.gmra.mrb[2].mxu1 %vm449_vm4, %v409_v21 }
 0x29c   : > { %1075 = vmatprep.mubr.msk.f32.mxu1 %vm449_vm4, %v410_v22 }
 0x29f   : > { %1076 = vmatmul.mubr.msk.f32.gmra.mrb[4].mxu1 %vm449_vm4, %v411_v23 }
 0x36e   : > { %v1074_v30 = vpop.f32.mrb[2].mxu1 }
 0x36f   : > { %v719_v31 = vadd.f32 %v1074_v30, %v619_v29  ;;  %v713_v32 = vpop.f32.mrb[3].mxu1 }
 0x370   : > { %v714_v33 = vadd.f32 %v713_v32, %v614_v28 }
 0x371   : > { %v1007_v34 = vmul.f32 -1.442695, %v719_v31 }
 0x372   : > { %v1006_v35 = vmul.f32 -1.442695, %v714_v33  ;;  %v1077_v37 = vpop.f32.mrb[4].mxu1 }
 0x373   : > { %1276 = vpow2.f32 %v1007_v34  ;;  %v729_v39 = vadd.f32 %v1077_v37, %v629_v36  ;;  %v723_v40 = vpop.f32.mrb[5].mxu1 }
 0x374   : > { %1278 = vpow2.f32 %v1006_v35  ;;  %v724_v41 = vadd.f32 %v723_v40, %v624_v38 }
 0x375   : > { %v1009_v42 = vmul.f32 -1.442695, %v729_v39 }
 0x376   : > { %v1008_v43 = vmul.f32 -1.442695, %v724_v41 }
 0x378   : > { %1280 = vpow2.f32 %v1008_v43 }
 0x379   : > { %1282 = vpow2.f32 %v1009_v42 }
 0x37d   : > { %v1277_v44 = vpop.eup %1276 }
 0x37e   : > { %v1279_v45 = vpop.eup %1278  ;;  %v745_v46 = vadd.f32 1.0, %v1277_v44 }
 0x37f   : > { %v744_v47 = vadd.f32 1.0, %v1279_v45 }
 0x381   : > { %1284 = vrcp.f32 %v744_v47 }
 0x382   : > { %v1281_v48 = vpop.eup %1280  ;;  %1286 = vrcp.f32 %v745_v46 }
 0x383   : > { %v746_v56 = vadd.f32 1.0, %v1281_v48  ;;  %v1283_v57 = vpop.eup %1282 }
 0x384   : > { %v747_v58 = vadd.f32 1.0, %v1283_v57 }
 0x385   : > { %1288 = vrcp.f32 %v746_v56 }
 0x386   : > { %1290 = vrcp.f32 %v747_v58 }
 0x38b   : > { %v1285_v60 = vpop.eup %1284 }
 0x38c   : > { %v756_v61 = vadd.f32 1.0, %v1285_v60  ;;  %v1287_v62 = vpop.eup %1286 }
 0x38d   : > { %v757_v63 = vadd.f32 1.0, %v1287_v62 }
 0x38e   : > { %1010 = vmatmul.mubr.msk.f32.vlgmr.msra.gmra.mrb[8].mxu0 %vm762_vm1, %v756_v61 }
 0x38f   : > { %845 = vmatprep.mubr.f32.mxu0 %v1364_v27  ;;  %v1289_v0 = vpop.eup %1288 }
 0x390   : > { %v758_v1 = vadd.f32 1.0, %v1289_v0  ;;  %v1291_v2 = vpop.eup %1290 }
 0x391   : > { %v759_v3 = vadd.f32 1.0, %v1291_v2 }
 0x392   : > { %1011 = vmatmul.mubr.msk.f32.gmra.mrb[10].mxu0 %vm762_vm1, %v757_v63 }
 0x393   : > { %851 = vmatprep.mubr.f32.mxu0 %v1364_v27 }
 0x396   : > { %1012 = vmatmul.mubr.msk.f32.gmra.mrb[12].mxu0 %vm762_vm1, %v758_v1 }
 0x397   : > { %857 = vmatprep.mubr.f32.mxu0 %v1364_v27 }
 0x39a   : > { %1013 = vmatmul.mubr.msk.f32.gmra.mrb[14].mxu0 %vm762_vm1, %v759_v3 }
 0x461   : > { %v841_v4 = vpop.f32.mrb[8].mxu0 }
 0x462   : > { %v864_v5 = vmul.f32 %v841_v4, %v1564_v49  ;;  %v843_v6 = vpop.f32.mrb[9].mxu0 }
 0x463   : > { %v865_v7 = vmul.f32 %v843_v6, %v1518_v25 }
 0x464   : > { %872 = vst [vmem:[%s271_s18] sm:$0xff] %v864_v5 }
 0x465   : > { %873 = vst [vmem:[%s271_s18 + $0x8] sm:$0xff] %v865_v7  ;;  %v847_v8 = vpop.f32.mrb[10].mxu0 }
 0x466   : > { %v866_v9 = vmul.f32 %v847_v8, %v1572_v51  ;;  %v849_v10 = vpop.f32.mrb[11].mxu0 }
 0x467   : > { %v867_v11 = vmul.f32 %v849_v10, %v1567_v50 }
 0x468   : > { %874 = vst [vmem:[%s271_s18 + $0x10] sm:$0xff] %v866_v9 }
 0x469   : > { %875 = vst [vmem:[%s271_s18 + $0x18] sm:$0xff] %v867_v11  ;;  %v853_v12 = vpop.f32.mrb[12].mxu0 }
 0x46a   : > { %v868_v14 = vmul.f32 %v853_v12, %v1580_v53  ;;  %v855_v49 = vpop.f32.mrb[13].mxu0 }
 0x46b   : > { %v869_v15 = vmul.f32 %v855_v49, %v1575_v52 }
 0x46c   : > { %876 = vst [vmem:[%s271_s18 + $0x20] sm:$0xff] %v868_v14 }
 0x46d   : > { %877 = vst [vmem:[%s271_s18 + $0x28] sm:$0xff] %v869_v15  ;;  %v859_v25 = vpop.f32.mrb[14].mxu0 }
 0x46e   : > { %v870_v51 = vmul.f32 %v859_v25, %v1588_v55  ;;  %v861_v16 = vpop.f32.mrb[15].mxu0 }
 0x46f   : > { %v871_v50 = vmul.f32 %v861_v16, %v1583_v54 }
 0x470   : > { %878 = vst [vmem:[%s271_s18 + $0x30] sm:$0xff] %v870_v51 }
 0x471   : > { %879 = vst [vmem:[%s271_s18 + $0x38] sm:$0xff] %v871_v50 }
 0x472   : > { %1305 = shalt.err (!%p1302_p3)
}
 0x473   : > { %s1306_s17 = scalar_lea.hbm %s1701_s29, 1024  ;;  %s1310_s16 = scalar_lea.hbm %s1756_s7, 2048 }
 0x474   : > { %p1307_p4 = scmp.ne.s32.totalorder %s1701_s29, %s1306_s17  ;;  %p1311_p9 = scmp.lt.u32.totalorder %s1701_s29, %s1756_s7 }
 0x475   : > { %p1312_p10 = scmp.lt.u32.totalorder %s1310_s16, %s1306_s17  ;;  %p1314_p12 = scmp.lt.u32.totalorder %s1306_s17, %s1701_s29 }
 0x476   : > { %p1308_p7 = pnand %p1307_p4, %p1446_p5 }
 0x477   : > { %p1313_p11 = por %p1312_p10, %p1311_p9 }
 0x478   : > { %p1309_p8 = pneg %p1308_p7 }
 0x479   : > { %p1315_p13 = por %p1314_p12, %p1313_p11 }
 0x47b   : > { %p1316_p0 = pnand %p1315_p13, %p1309_p8 }
 0x47d   : > { %1319 = shalt.err (!%p1316_p0)
}
 0x47e   : > { %s1366_s22 = smov 256   ;;  %s1367_s23 = smov 16  }
 0x47f   : > { %1164 = dma.vmem_to_hbm [thread:$0]  (%p1446_p5), %s1703_s21, 1024, %s1701_s29, %s1708_s28, %s1366_s22, %s1366_s22, %s1367_s23  }
 0x480 PF: > { %p1170_p1 = scmp.ge.s32.totalorder %s1354_s27, 2  ;;  %s909_s8 = sand.u32 1, %s1342_s24  }
 0x481   : > { %s910_s20 = scalar_lea.sflag [#allocation3], %s909_s8 }
 0x482   : > { %p1167_p2 = pnand %p1170_p1, %p1450_p6 }
 0x484   : > { %1337 = dma.done.wait (!%p1167_p2), %s910_s20, 1024  }
 0x485   : > { %1339 = vsyncadd (!%p1167_p2), %s910_s20, 4294966272  ;;  %p17_p3 = scmp.ge.s32.totalorder %s1433_s30, 4   ;;  %s1763_s24 = smov %s1346_s25 }
 0x486   : > { %s1764_s25 = smov %s1350_s26  ;;  %s1765_s26 = smov %s1444_s10 }
 0x487   : > { %s1766_s27 = smov %s1433_s30  ;;  %19 = sbr.rel (!%p17_p3) target bundleno = 3 (0x3), region = 83 }
 0x48e   :  { %915 = vsyncpa [#allocation3], 1 }
 0x48f   :  { %917 = vsyncpa [#allocation3 + $0x1], 1 }

</bundles_post_ra>
